<compile_context>
chip_gen: v7x
topology: tpu7x:2x2x1
jax: 0.10.0
libtpu: 0.0.40
codegen_flags: <defaults>
</compile_context>

<pallas_src>
import numpy as np
import jax
import jax.numpy as jnp
from jax.experimental import pallas as pl
from jax.experimental.pallas import tpu as pltpu

LANE = 128


# ----------------------------- Pallas kernel ------------------------------- #

def _make_kernel(C, masked, mC=None, fC=None):
    """One grid step == (latent i, spatial block rb).

    Per channel c:
        out[c] = (sum_d wmsc[i,c,d] * x[d]) + bsc[i,c] + x[c]
        (wmsc already contains 1/(sigma_i^2+1); bsc is the collapsed CFG bias)
    Masked:
        out[c] = out[c] + m * (x_frozen[c] - out[c])
    """
    def kernel(wmsc_ref, bsc_ref, x_ref, *rest):
        if masked:
            m_ref, f_ref, o_ref = rest
        else:
            (o_ref,) = rest

        i = pl.program_id(0)
        base = i * C

        # Load every channel slab of this spatial block once (upcast for v5e-safe
        # f32 compute when the streamed dtype is bf16).
        xs = [x_ref[0, d].astype(jnp.float32) for d in range(C)]

        if masked and mC == 1:
            m_b = m_ref[0, 0].astype(jnp.float32)
        if masked and fC == 1:
            f_b = f_ref[0, 0].astype(jnp.float32)

        for c in range(C):                          # static unroll over channels
            # channel mix on the VPU (scalar-broadcast MACs; scale pre-folded)
            acc = wmsc_ref[(base + c) * C] * xs[0]
            for d in range(1, C):
                acc = acc + wmsc_ref[(base + c) * C + d] * xs[d]
            den = acc + bsc_ref[base + c] + xs[c]

            if masked:
                m = m_b if mC == 1 else m_ref[0, c].astype(jnp.float32)
                f = f_b if fC == 1 else f_ref[0, c].astype(jnp.float32)
                den = den + m * (f - den)           # 3 VPU ops (vs 4 for lerp form)

            o_ref[0, c] = den.astype(o_ref.dtype)   # direct per-channel store

    return kernel


# ------------------------------ wrapper (glue) ------------------------------ #

def kcfg_denoiser_masked_forward(params, x, sigma, uncond, cond, cond_scale,
                                 cond_arities=None, cond_weights=None,
                                 use_half=False, mask=None, x_frozen=None):
    wmix = params["wmix"].astype(jnp.float32)     # (C, C)
    wproj = params["wproj"].astype(jnp.float32)   # (D, C)

    U, C, H, W = x.shape
    HW = H * W
    assert HW % LANE == 0, "H*W must be a multiple of 128 for lane-dense rows"
    rpc = HW // LANE                              # sublane rows per channel

    arities = np.asarray(cond_arities, dtype=np.int32)
    assert arities.shape[0] == U and (arities >= 1).all()
    ncond = int(arities.sum())
    assert cond.shape[0] == ncond and uncond.shape[0] == U
    weights = np.asarray(list(cond_weights), dtype=np.float32)
    assert weights.shape[0] == ncond, "len(cond_weights) must equal sum(cond_arities)"

    # bf16 storage for all streamed tensors under use_half (HBM-bound on v5e/v6e);
    # compute stays f32 inside the kernel.
    io_dtype = jnp.bfloat16 if use_half else jnp.float32
    bytes_per_el = 2 if use_half else 4

    # ---- scalar glue (tiny, plain JAX) -------------------------------------
    # cond projection of the synthetic inner model: bias(cond) = mean_tokens(cond) @ Wproj
    cond_in = jnp.concatenate([uncond.astype(jnp.float32),
                               cond.astype(jnp.float32)], axis=0)     # (U+ncond, T, D)
    bias_all = jnp.mean(cond_in, axis=1) @ wproj                      # (U+ncond, C)
    bu, bc = bias_all[:U], bias_all[U:]

    # CFG collapse (exact because this inner model is affine in the cond bias):
    #   denoised_i = x_i + inv_i*(Wmix@x_i) + inv_i*(bu_i + sum_k w'_{ik}(bc_{ik}-bu_i))
    # TODO(synk): a real (non-affine) inner_model needs the general per-cond forward path.
    seg_id = jnp.asarray(np.repeat(np.arange(U), arities))
    w_all = jnp.asarray(weights) * jnp.float32(cond_scale)            # (ncond,)
    bu_rep = jnp.repeat(bu, jnp.asarray(arities), axis=0, total_repeat_length=ncond)
    biasp = bu + jax.ops.segment_sum((bc - bu_rep) * w_all[:, None],
                                     seg_id, num_segments=U)          # (U, C)

    sigma_flat = jnp.reshape(sigma, (U,)).astype(jnp.float32)
    inv = 1.0 / (sigma_flat * sigma_flat + 1.0)                       # (U,)

    # fold inv into the SMEM tables; flatten to 1-D to dodge [8,128]-word SMEM padding
    wmsc = (wmix[None, :, :] * inv[:, None, None]).reshape(U * C * C)  # (U*C*C,)
    bsc = (biasp * inv[:, None]).reshape(U * C)                        # (U*C,)

    # ---- tensor layout / blocking ------------------------------------------
    x4 = x.astype(io_dtype).reshape(U, C, rpc, LANE)

    # Block the sublane (rpc) axis only; lane axis stays a full 128 row.
    # Budget: masked path streams 4 tensors x 2 pipeline buffers -> keep
    # 8 * block_bytes <= ~24 MiB so it fits v7x's 64 MiB (32 MiB scoped) VMEM.
    max_block_bytes = 3 * 1024 * 1024
    rblk = rpc
    if rpc * C * LANE * bytes_per_el > max_block_bytes and rpc % 8 == 0:
        for cand in range(rpc - 8, 0, -8):
            if rpc % cand == 0 and cand * C * LANE * bytes_per_el <= max_block_bytes:
                rblk = cand
                break
    n_rblk = rpc // rblk
    # NOTE: at demo sizes (rpc=2) everything is a single full-extent block per
    # latent; we keep the (U, n_rblk) grid with both axes "parallel" so v7x's
    # two TensorCores shard the steps (grid-collapse only pays on single-core chips).

    smem_spec = pl.BlockSpec(memory_space=pltpu.MemorySpace.SMEM)
    x_spec = pl.BlockSpec((1, C, rblk, LANE), lambda i, rb: (i, 0, rb, 0))
    out_spec = pl.BlockSpec((1, C, rblk, LANE), lambda i, rb: (i, 0, rb, 0))

    in_specs = [smem_spec, smem_spec, x_spec]
    args = [wmsc, bsc, x4]

    masked = mask is not None
    mC = fC = None
    if masked:
        assert x_frozen is not None
        # Stream mask / x_frozen in their natural shapes (batch/channel dims may be
        # 1 or full) -- no HBM broadcast materialization; broadcast inside the kernel.
        def conform(t):
            t = jnp.asarray(t)
            assert t.ndim == 4 and t.shape[2] == H and t.shape[3] == W
            assert t.shape[0] in (1, U) and t.shape[1] in (1, C)
            return t.astype(io_dtype).reshape(t.shape[0], t.shape[1], rpc, LANE)
        m4, f4 = conform(mask), conform(x_frozen)
        mB, mC = m4.shape[0], m4.shape[1]
        fB, fC = f4.shape[0], f4.shape[1]
        m_spec = pl.BlockSpec((1, mC, rblk, LANE),
                              (lambda i, rb: (i, 0, rb, 0)) if mB == U
                              else (lambda i, rb: (0, 0, rb, 0)))
        f_spec = pl.BlockSpec((1, fC, rblk, LANE),
                              (lambda i, rb: (i, 0, rb, 0)) if fB == U
                              else (lambda i, rb: (0, 0, rb, 0)))
        in_specs += [m_spec, f_spec]
        args += [m4, f4]

    out = pl.pallas_call(
        _make_kernel(C, masked, mC, fC),
        out_shape=jax.ShapeDtypeStruct((U, C, rpc, LANE), io_dtype),
        grid_spec=pltpu.PrefetchScalarGridSpec(
            num_scalar_prefetch=0,
            grid=(U, n_rblk),
            in_specs=in_specs,
            out_specs=out_spec),
        compiler_params=pltpu.CompilerParams(
            dimension_semantics=("parallel", "parallel"),
            vmem_limit_bytes=32 * 1024 * 1024),
    )(*args)

    return out.reshape(U, C, H, W)


# -------------------------- pure-JAX reference ------------------------------ #

def reference_forward(params, x, sigma, uncond, cond, cond_scale, cond_arities,
                      cond_weights, mask=None, x_frozen=None):
    """General (non-collapsed) CFG combine, mirroring the PyTorch module."""
    wmix = params["wmix"].astype(jnp.float32)
    wproj = params["wproj"].astype(jnp.float32)
    U, C, H, W = x.shape
    HW = H * W
    arities = np.asarray(cond_arities)
    ncond = int(arities.sum())
    rep = jnp.asarray(arities)

    cond_in = jnp.concatenate([uncond.astype(jnp.float32),
                               cond.astype(jnp.float32)], axis=0)
    x_in = jnp.concatenate(
        [x, jnp.repeat(x, rep, axis=0, total_repeat_length=ncond)], axis=0)
    sigma_flat = jnp.reshape(sigma, (U,))
    sigma_in = jnp.concatenate(
        [sigma_flat, jnp.repeat(sigma_flat, rep, axis=0, total_repeat_length=ncond)],
        axis=0)

    # synthetic inner model (same math as the Pallas kernel)
    N = U + ncond
    xin_f = x_in.reshape(N, C, HW).astype(jnp.float32)
    bias = (jnp.mean(cond_in, axis=1) @ wproj)[:, :, None]
    mixed = jnp.sum(wmix[None, :, :, None] * xin_f[:, None, :, :], axis=2)
    scale = (1.0 / (sigma_in.astype(jnp.float32) ** 2 + 1.0))[:, None, None]
    model_out = (mixed + bias) * scale + xin_f

    uncond_out = model_out[:U]
    conds_out = model_out[U:]
    unconds = jnp.repeat(uncond_out, rep, axis=0, total_repeat_length=ncond)
    wt = (jnp.asarray(list(cond_weights), jnp.float32) * cond_scale)[:, None, None]
    deltas = (conds_out - unconds) * wt
    seg_id = jnp.asarray(np.repeat(np.arange(U), arities))
    cond_sum = jax.ops.segment_sum(deltas, seg_id, num_segments=U)
    denoised = (uncond_out + cond_sum).reshape(U, C, H, W)
    if mask is not None:
        denoised = x_frozen * mask + denoised * (1.0 - mask)
    return denoised


# ---------------------------------- main ------------------------------------ #

if __name__ == "__main__":
    key = jax.random.PRNGKey(0)
    U, C, H, W = 2, 4, 16, 16          # latent batch (uncond_count), NCHW
    T, D = 8, 32                       # cond embedding: seq, hidden
    cond_arities = (2, 3)
    cond_weights = (0.6, 0.4, 0.5, 0.3, 0.2)
    cond_scale = 7.5
    ncond = int(sum(cond_arities))

    ks = jax.random.split(key, 8)
    x = jax.random.normal(ks[0], (U, C, H, W), jnp.float32)
    sigma = jnp.abs(jax.random.normal(ks[1], (U, 1, 1, 1), jnp.float32)) + 0.5
    uncond = jax.random.normal(ks[2], (U, T, D), jnp.float32)
    cond = jax.random.normal(ks[3], (ncond, T, D), jnp.float32)
    mask = (jax.random.uniform(ks[4], (U, 1, H, W)) > 0.5).astype(jnp.float32)
    x_frozen = jax.random.normal(ks[5], (U, C, H, W), jnp.float32)

    # deterministic synthetic "inner model" parameters
    params = {
        "wmix": jax.random.normal(ks[6], (C, C), jnp.float32) * 0.5,
        "wproj": jax.random.normal(ks[7], (D, C), jnp.float32) * (1.0 / np.sqrt(D)),
    }

    # 1) masked, f32
    out_m = jax.block_until_ready(kcfg_denoiser_masked_forward(
        params, x, sigma, uncond, cond, cond_scale,
        cond_arities=cond_arities, cond_weights=cond_weights,
        use_half=False, mask=mask, x_frozen=x_frozen))
    ref_m = jax.block_until_ready(reference_forward(
        params, x, sigma, uncond, cond, cond_scale, cond_arities, cond_weights,
        mask=mask, x_frozen=x_frozen))
    np.testing.assert_allclose(np.asarray(out_m), np.asarray(ref_m),
                               rtol=2e-3, atol=2e-3)

    # 2) no-mask, f32 (leaner kernel variant: no mask / x_frozen DMAs, no blend)
    out_u = jax.block_until_ready(kcfg_denoiser_masked_forward(
        params, x, sigma, uncond, cond, cond_scale,
        cond_arities=cond_arities, cond_weights=cond_weights, use_half=False))
    ref_u = jax.block_until_ready(reference_forward(
        params, x, sigma, uncond, cond, cond_scale, cond_arities, cond_weights))
    np.testing.assert_allclose(np.asarray(out_u), np.asarray(ref_u),
                               rtol=2e-3, atol=2e-3)

    # 3) no-mask, use_half (bf16 HBM storage, f32 in-kernel compute)
    out_h = jax.block_until_ready(kcfg_denoiser_masked_forward(
        params, x, sigma, uncond, cond, cond_scale,
        cond_arities=cond_arities, cond_weights=cond_weights, use_half=True))
    x_h = x.astype(jnp.bfloat16).astype(jnp.float32)   # bf16-consistent reference input
    ref_h = jax.block_until_ready(reference_forward(
        params, x_h, sigma, uncond, cond, cond_scale, cond_arities, cond_weights))
    np.testing.assert_allclose(np.asarray(out_h.astype(jnp.float32)),
                               np.asarray(ref_h), rtol=2e-2, atol=5e-2)

    print("KERNEL_OK")
</pallas_src>

<mosaic_0001>
module attributes {stable_mosaic.version = 11 : i64} {
  func.func @kernel(%arg0: i32, %arg1: i32, %arg2: memref<32xf32, #tpu.memory_space<smem>>, %arg3: memref<8xf32, #tpu.memory_space<smem>>, %arg4: memref<1x4x2x128xf32, #tpu.memory_space<vmem>>, %arg5: memref<1x1x2x128xf32, #tpu.memory_space<vmem>>, %arg6: memref<1x4x2x128xf32, #tpu.memory_space<vmem>>, %arg7: memref<1x4x2x128xf32, #tpu.memory_space<vmem>>) attributes {dimension_semantics = [#tpu.dimension_semantics<parallel>, #tpu.dimension_semantics<parallel>], iteration_bounds = array<i64: 2, 1>, scalar_prefetch = 0 : i64, scratch_operands = 0 : i64, tpu.core_type = #tpu.core_type<tc>, window_params = [{transform_indices = @transform_0, window_bounds = array<i64: 32>}, {transform_indices = @transform_1, window_bounds = array<i64: 8>}, {transform_indices = @transform_2, window_bounds = array<i64: 1, 4, 2, 128>}, {transform_indices = @transform_3, window_bounds = array<i64: 1, 1, 2, 128>}, {transform_indices = @transform_4, window_bounds = array<i64: 1, 4, 2, 128>}, {transform_indices = @transform_5, window_bounds = array<i64: 1, 4, 2, 128>}]} {
    %c4_i32 = arith.constant 4 : i32
    %0 = arith.muli %arg0, %c4_i32 : i32
    %c0 = arith.constant 0 : index
    %c0_0 = arith.constant 0 : index
    %c0_1 = arith.constant 0 : index
    %c0_2 = arith.constant 0 : index
    %1 = vector.load %arg4[%c0, %c0_0, %c0_1, %c0_2] : memref<1x4x2x128xf32, #tpu.memory_space<vmem>>, vector<1x1x2x128xf32>
    %2 = vector.shape_cast %1 : vector<1x1x2x128xf32> to vector<2x128xf32>
    %c0_3 = arith.constant 0 : index
    %c1 = arith.constant 1 : index
    %c0_4 = arith.constant 0 : index
    %c0_5 = arith.constant 0 : index
    %3 = vector.load %arg4[%c0_3, %c1, %c0_4, %c0_5] : memref<1x4x2x128xf32, #tpu.memory_space<vmem>>, vector<1x1x2x128xf32>
    %4 = vector.shape_cast %3 : vector<1x1x2x128xf32> to vector<2x128xf32>
    %c0_6 = arith.constant 0 : index
    %c2 = arith.constant 2 : index
    %c0_7 = arith.constant 0 : index
    %c0_8 = arith.constant 0 : index
    %5 = vector.load %arg4[%c0_6, %c2, %c0_7, %c0_8] : memref<1x4x2x128xf32, #tpu.memory_space<vmem>>, vector<1x1x2x128xf32>
    %6 = vector.shape_cast %5 : vector<1x1x2x128xf32> to vector<2x128xf32>
    %c0_9 = arith.constant 0 : index
    %c3 = arith.constant 3 : index
    %c0_10 = arith.constant 0 : index
    %c0_11 = arith.constant 0 : index
    %7 = vector.load %arg4[%c0_9, %c3, %c0_10, %c0_11] : memref<1x4x2x128xf32, #tpu.memory_space<vmem>>, vector<1x1x2x128xf32>
    %8 = vector.shape_cast %7 : vector<1x1x2x128xf32> to vector<2x128xf32>
    %c0_12 = arith.constant 0 : index
    %c0_13 = arith.constant 0 : index
    %c0_14 = arith.constant 0 : index
    %c0_15 = arith.constant 0 : index
    %9 = vector.load %arg5[%c0_12, %c0_13, %c0_14, %c0_15] : memref<1x1x2x128xf32, #tpu.memory_space<vmem>>, vector<1x1x2x128xf32>
    %10 = vector.shape_cast %9 : vector<1x1x2x128xf32> to vector<2x128xf32>
    %c0_i32 = arith.constant 0 : i32
    %11 = arith.addi %0, %c0_i32 : i32
    %c4_i32_16 = arith.constant 4 : i32
    %12 = arith.muli %11, %c4_i32_16 : i32
    %13 = arith.index_cast %12 : i32 to index
    %14 = memref.load %arg2[%13] : memref<32xf32, #tpu.memory_space<smem>>
    %15 = vector.broadcast %14 : f32 to vector<2x128xf32>
    %16 = arith.mulf %15, %2 : vector<2x128xf32>
    %c0_i32_17 = arith.constant 0 : i32
    %17 = arith.addi %0, %c0_i32_17 : i32
    %c4_i32_18 = arith.constant 4 : i32
    %18 = arith.muli %17, %c4_i32_18 : i32
    %c1_i32 = arith.constant 1 : i32
    %19 = arith.addi %18, %c1_i32 : i32
    %20 = arith.index_cast %19 : i32 to index
    %21 = memref.load %arg2[%20] : memref<32xf32, #tpu.memory_space<smem>>
    %22 = vector.broadcast %21 : f32 to vector<2x128xf32>
    %23 = arith.mulf %22, %4 : vector<2x128xf32>
    %24 = arith.addf %16, %23 : vector<2x128xf32>
    %c0_i32_19 = arith.constant 0 : i32
    %25 = arith.addi %0, %c0_i32_19 : i32
    %c4_i32_20 = arith.constant 4 : i32
    %26 = arith.muli %25, %c4_i32_20 : i32
    %c2_i32 = arith.constant 2 : i32
    %27 = arith.addi %26, %c2_i32 : i32
    %28 = arith.index_cast %27 : i32 to index
    %29 = memref.load %arg2[%28] : memref<32xf32, #tpu.memory_space<smem>>
    %30 = vector.broadcast %29 : f32 to vector<2x128xf32>
    %31 = arith.mulf %30, %6 : vector<2x128xf32>
    %32 = arith.addf %24, %31 : vector<2x128xf32>
    %c0_i32_21 = arith.constant 0 : i32
    %33 = arith.addi %0, %c0_i32_21 : i32
    %c4_i32_22 = arith.constant 4 : i32
    %34 = arith.muli %33, %c4_i32_22 : i32
    %c3_i32 = arith.constant 3 : i32
    %35 = arith.addi %34, %c3_i32 : i32
    %36 = arith.index_cast %35 : i32 to index
    %37 = memref.load %arg2[%36] : memref<32xf32, #tpu.memory_space<smem>>
    %38 = vector.broadcast %37 : f32 to vector<2x128xf32>
    %39 = arith.mulf %38, %8 : vector<2x128xf32>
    %40 = arith.addf %32, %39 : vector<2x128xf32>
    %c0_i32_23 = arith.constant 0 : i32
    %41 = arith.addi %0, %c0_i32_23 : i32
    %42 = arith.index_cast %41 : i32 to index
    %43 = memref.load %arg3[%42] : memref<8xf32, #tpu.memory_space<smem>>
    %44 = vector.broadcast %43 : f32 to vector<2x128xf32>
    %45 = arith.addf %40, %44 : vector<2x128xf32>
    %46 = arith.addf %45, %2 : vector<2x128xf32>
    %c0_24 = arith.constant 0 : index
    %c0_25 = arith.constant 0 : index
    %c0_26 = arith.constant 0 : index
    %c0_27 = arith.constant 0 : index
    %47 = vector.load %arg6[%c0_24, %c0_25, %c0_26, %c0_27] : memref<1x4x2x128xf32, #tpu.memory_space<vmem>>, vector<1x1x2x128xf32>
    %48 = vector.shape_cast %47 : vector<1x1x2x128xf32> to vector<2x128xf32>
    %49 = arith.subf %48, %46 : vector<2x128xf32>
    %50 = arith.mulf %10, %49 : vector<2x128xf32>
    %51 = arith.addf %46, %50 : vector<2x128xf32>
    %c0_28 = arith.constant 0 : index
    %c0_29 = arith.constant 0 : index
    %c0_30 = arith.constant 0 : index
    %c0_31 = arith.constant 0 : index
    %52 = vector.load %arg7[%c0_28, %c0_29, %c0_30, %c0_31] : memref<1x4x2x128xf32, #tpu.memory_space<vmem>>, vector<1x1x2x128xf32>
    %53 = vector.shape_cast %52 : vector<1x1x2x128xf32> to vector<2x128xf32>
    %54 = vector.shape_cast %51 : vector<2x128xf32> to vector<1x1x2x128xf32>
    tpu.vector_store %arg7[%c0_28, %c0_29, %c0_30, %c0_31], %54 {strides = array<i32>} : memref<1x4x2x128xf32, #tpu.memory_space<vmem>>, vector<1x1x2x128xf32>,
    %c1_i32_32 = arith.constant 1 : i32
    %55 = arith.addi %0, %c1_i32_32 : i32
    %c4_i32_33 = arith.constant 4 : i32
    %56 = arith.muli %55, %c4_i32_33 : i32
    %57 = arith.index_cast %56 : i32 to index
    %58 = memref.load %arg2[%57] : memref<32xf32, #tpu.memory_space<smem>>
    %59 = vector.broadcast %58 : f32 to vector<2x128xf32>
    %60 = arith.mulf %59, %2 : vector<2x128xf32>
    %c1_i32_34 = arith.constant 1 : i32
    %61 = arith.addi %0, %c1_i32_34 : i32
    %c4_i32_35 = arith.constant 4 : i32
    %62 = arith.muli %61, %c4_i32_35 : i32
    %c1_i32_36 = arith.constant 1 : i32
    %63 = arith.addi %62, %c1_i32_36 : i32
    %64 = arith.index_cast %63 : i32 to index
    %65 = memref.load %arg2[%64] : memref<32xf32, #tpu.memory_space<smem>>
    %66 = vector.broadcast %65 : f32 to vector<2x128xf32>
    %67 = arith.mulf %66, %4 : vector<2x128xf32>
    %68 = arith.addf %60, %67 : vector<2x128xf32>
    %c1_i32_37 = arith.constant 1 : i32
    %69 = arith.addi %0, %c1_i32_37 : i32
    %c4_i32_38 = arith.constant 4 : i32
    %70 = arith.muli %69, %c4_i32_38 : i32
    %c2_i32_39 = arith.constant 2 : i32
    %71 = arith.addi %70, %c2_i32_39 : i32
    %72 = arith.index_cast %71 : i32 to index
    %73 = memref.load %arg2[%72] : memref<32xf32, #tpu.memory_space<smem>>
    %74 = vector.broadcast %73 : f32 to vector<2x128xf32>
    %75 = arith.mulf %74, %6 : vector<2x128xf32>
    %76 = arith.addf %68, %75 : vector<2x128xf32>
    %c1_i32_40 = arith.constant 1 : i32
    %77 = arith.addi %0, %c1_i32_40 : i32
    %c4_i32_41 = arith.constant 4 : i32
    %78 = arith.muli %77, %c4_i32_41 : i32
    %c3_i32_42 = arith.constant 3 : i32
    %79 = arith.addi %78, %c3_i32_42 : i32
    %80 = arith.index_cast %79 : i32 to index
    %81 = memref.load %arg2[%80] : memref<32xf32, #tpu.memory_space<smem>>
    %82 = vector.broadcast %81 : f32 to vector<2x128xf32>
    %83 = arith.mulf %82, %8 : vector<2x128xf32>
    %84 = arith.addf %76, %83 : vector<2x128xf32>
    %c1_i32_43 = arith.constant 1 : i32
    %85 = arith.addi %0, %c1_i32_43 : i32
    %86 = arith.index_cast %85 : i32 to index
    %87 = memref.load %arg3[%86] : memref<8xf32, #tpu.memory_space<smem>>
    %88 = vector.broadcast %87 : f32 to vector<2x128xf32>
    %89 = arith.addf %84, %88 : vector<2x128xf32>
    %90 = arith.addf %89, %4 : vector<2x128xf32>
    %c0_44 = arith.constant 0 : index
    %c1_45 = arith.constant 1 : index
    %c0_46 = arith.constant 0 : index
    %c0_47 = arith.constant 0 : index
    %91 = vector.load %arg6[%c0_44, %c1_45, %c0_46, %c0_47] : memref<1x4x2x128xf32, #tpu.memory_space<vmem>>, vector<1x1x2x128xf32>
    %92 = vector.shape_cast %91 : vector<1x1x2x128xf32> to vector<2x128xf32>
    %93 = arith.subf %92, %90 : vector<2x128xf32>
    %94 = arith.mulf %10, %93 : vector<2x128xf32>
    %95 = arith.addf %90, %94 : vector<2x128xf32>
    %c0_48 = arith.constant 0 : index
    %c1_49 = arith.constant 1 : index
    %c0_50 = arith.constant 0 : index
    %c0_51 = arith.constant 0 : index
    %96 = vector.load %arg7[%c0_48, %c1_49, %c0_50, %c0_51] : memref<1x4x2x128xf32, #tpu.memory_space<vmem>>, vector<1x1x2x128xf32>
    %97 = vector.shape_cast %96 : vector<1x1x2x128xf32> to vector<2x128xf32>
    %98 = vector.shape_cast %95 : vector<2x128xf32> to vector<1x1x2x128xf32>
    tpu.vector_store %arg7[%c0_48, %c1_49, %c0_50, %c0_51], %98 {strides = array<i32>} : memref<1x4x2x128xf32, #tpu.memory_space<vmem>>, vector<1x1x2x128xf32>,
    %c2_i32_52 = arith.constant 2 : i32
    %99 = arith.addi %0, %c2_i32_52 : i32
    %c4_i32_53 = arith.constant 4 : i32
    %100 = arith.muli %99, %c4_i32_53 : i32
    %101 = arith.index_cast %100 : i32 to index
    %102 = memref.load %arg2[%101] : memref<32xf32, #tpu.memory_space<smem>>
    %103 = vector.broadcast %102 : f32 to vector<2x128xf32>
    %104 = arith.mulf %103, %2 : vector<2x128xf32>
    %c2_i32_54 = arith.constant 2 : i32
    %105 = arith.addi %0, %c2_i32_54 : i32
    %c4_i32_55 = arith.constant 4 : i32
    %106 = arith.muli %105, %c4_i32_55 : i32
    %c1_i32_56 = arith.constant 1 : i32
    %107 = arith.addi %106, %c1_i32_56 : i32
    %108 = arith.index_cast %107 : i32 to index
    %109 = memref.load %arg2[%108] : memref<32xf32, #tpu.memory_space<smem>>
    %110 = vector.broadcast %109 : f32 to vector<2x128xf32>
    %111 = arith.mulf %110, %4 : vector<2x128xf32>
    %112 = arith.addf %104, %111 : vector<2x128xf32>
    %c2_i32_57 = arith.constant 2 : i32
    %113 = arith.addi %0, %c2_i32_57 : i32
    %c4_i32_58 = arith.constant 4 : i32
    %114 = arith.muli %113, %c4_i32_58 : i32
    %c2_i32_59 = arith.constant 2 : i32
    %115 = arith.addi %114, %c2_i32_59 : i32
    %116 = arith.index_cast %115 : i32 to index
    %117 = memref.load %arg2[%116] : memref<32xf32, #tpu.memory_space<smem>>
    %118 = vector.broadcast %117 : f32 to vector<2x128xf32>
    %119 = arith.mulf %118, %6 : vector<2x128xf32>
    %120 = arith.addf %112, %119 : vector<2x128xf32>
    %c2_i32_60 = arith.constant 2 : i32
    %121 = arith.addi %0, %c2_i32_60 : i32
    %c4_i32_61 = arith.constant 4 : i32
    %122 = arith.muli %121, %c4_i32_61 : i32
    %c3_i32_62 = arith.constant 3 : i32
    %123 = arith.addi %122, %c3_i32_62 : i32
    %124 = arith.index_cast %123 : i32 to index
    %125 = memref.load %arg2[%124] : memref<32xf32, #tpu.memory_space<smem>>
    %126 = vector.broadcast %125 : f32 to vector<2x128xf32>
    %127 = arith.mulf %126, %8 : vector<2x128xf32>
    %128 = arith.addf %120, %127 : vector<2x128xf32>
    %c2_i32_63 = arith.constant 2 : i32
    %129 = arith.addi %0, %c2_i32_63 : i32
    %130 = arith.index_cast %129 : i32 to index
    %131 = memref.load %arg3[%130] : memref<8xf32, #tpu.memory_space<smem>>
    %132 = vector.broadcast %131 : f32 to vector<2x128xf32>
    %133 = arith.addf %128, %132 : vector<2x128xf32>
    %134 = arith.addf %133, %6 : vector<2x128xf32>
    %c0_64 = arith.constant 0 : index
    %c2_65 = arith.constant 2 : index
    %c0_66 = arith.constant 0 : index
    %c0_67 = arith.constant 0 : index
    %135 = vector.load %arg6[%c0_64, %c2_65, %c0_66, %c0_67] : memref<1x4x2x128xf32, #tpu.memory_space<vmem>>, vector<1x1x2x128xf32>
    %136 = vector.shape_cast %135 : vector<1x1x2x128xf32> to vector<2x128xf32>
    %137 = arith.subf %136, %134 : vector<2x128xf32>
    %138 = arith.mulf %10, %137 : vector<2x128xf32>
    %139 = arith.addf %134, %138 : vector<2x128xf32>
    %c0_68 = arith.constant 0 : index
    %c2_69 = arith.constant 2 : index
    %c0_70 = arith.constant 0 : index
    %c0_71 = arith.constant 0 : index
    %140 = vector.load %arg7[%c0_68, %c2_69, %c0_70, %c0_71] : memref<1x4x2x128xf32, #tpu.memory_space<vmem>>, vector<1x1x2x128xf32>
    %141 = vector.shape_cast %140 : vector<1x1x2x128xf32> to vector<2x128xf32>
    %142 = vector.shape_cast %139 : vector<2x128xf32> to vector<1x1x2x128xf32>
    tpu.vector_store %arg7[%c0_68, %c2_69, %c0_70, %c0_71], %142 {strides = array<i32>} : memref<1x4x2x128xf32, #tpu.memory_space<vmem>>, vector<1x1x2x128xf32>,
    %c3_i32_72 = arith.constant 3 : i32
    %143 = arith.addi %0, %c3_i32_72 : i32
    %c4_i32_73 = arith.constant 4 : i32
    %144 = arith.muli %143, %c4_i32_73 : i32
    %145 = arith.index_cast %144 : i32 to index
    %146 = memref.load %arg2[%145] : memref<32xf32, #tpu.memory_space<smem>>
    %147 = vector.broadcast %146 : f32 to vector<2x128xf32>
    %148 = arith.mulf %147, %2 : vector<2x128xf32>
    %c3_i32_74 = arith.constant 3 : i32
    %149 = arith.addi %0, %c3_i32_74 : i32
    %c4_i32_75 = arith.constant 4 : i32
    %150 = arith.muli %149, %c4_i32_75 : i32
    %c1_i32_76 = arith.constant 1 : i32
    %151 = arith.addi %150, %c1_i32_76 : i32
    %152 = arith.index_cast %151 : i32 to index
    %153 = memref.load %arg2[%152] : memref<32xf32, #tpu.memory_space<smem>>
    %154 = vector.broadcast %153 : f32 to vector<2x128xf32>
    %155 = arith.mulf %154, %4 : vector<2x128xf32>
    %156 = arith.addf %148, %155 : vector<2x128xf32>
    %c3_i32_77 = arith.constant 3 : i32
    %157 = arith.addi %0, %c3_i32_77 : i32
    %c4_i32_78 = arith.constant 4 : i32
    %158 = arith.muli %157, %c4_i32_78 : i32
    %c2_i32_79 = arith.constant 2 : i32
    %159 = arith.addi %158, %c2_i32_79 : i32
    %160 = arith.index_cast %159 : i32 to index
    %161 = memref.load %arg2[%160] : memref<32xf32, #tpu.memory_space<smem>>
    %162 = vector.broadcast %161 : f32 to vector<2x128xf32>
    %163 = arith.mulf %162, %6 : vector<2x128xf32>
    %164 = arith.addf %156, %163 : vector<2x128xf32>
    %c3_i32_80 = arith.constant 3 : i32
    %165 = arith.addi %0, %c3_i32_80 : i32
    %c4_i32_81 = arith.constant 4 : i32
    %166 = arith.muli %165, %c4_i32_81 : i32
    %c3_i32_82 = arith.constant 3 : i32
    %167 = arith.addi %166, %c3_i32_82 : i32
    %168 = arith.index_cast %167 : i32 to index
    %169 = memref.load %arg2[%168] : memref<32xf32, #tpu.memory_space<smem>>
    %170 = vector.broadcast %169 : f32 to vector<2x128xf32>
    %171 = arith.mulf %170, %8 : vector<2x128xf32>
    %172 = arith.addf %164, %171 : vector<2x128xf32>
    %c3_i32_83 = arith.constant 3 : i32
    %173 = arith.addi %0, %c3_i32_83 : i32
    %174 = arith.index_cast %173 : i32 to index
    %175 = memref.load %arg3[%174] : memref<8xf32, #tpu.memory_space<smem>>
    %176 = vector.broadcast %175 : f32 to vector<2x128xf32>
    %177 = arith.addf %172, %176 : vector<2x128xf32>
    %178 = arith.addf %177, %8 : vector<2x128xf32>
    %c0_84 = arith.constant 0 : index
    %c3_85 = arith.constant 3 : index
    %c0_86 = arith.constant 0 : index
    %c0_87 = arith.constant 0 : index
    %179 = vector.load %arg6[%c0_84, %c3_85, %c0_86, %c0_87] : memref<1x4x2x128xf32, #tpu.memory_space<vmem>>, vector<1x1x2x128xf32>
    %180 = vector.shape_cast %179 : vector<1x1x2x128xf32> to vector<2x128xf32>
    %181 = arith.subf %180, %178 : vector<2x128xf32>
    %182 = arith.mulf %10, %181 : vector<2x128xf32>
    %183 = arith.addf %178, %182 : vector<2x128xf32>
    %c0_88 = arith.constant 0 : index
    %c3_89 = arith.constant 3 : index
    %c0_90 = arith.constant 0 : index
    %c0_91 = arith.constant 0 : index
    %184 = vector.load %arg7[%c0_88, %c3_89, %c0_90, %c0_91] : memref<1x4x2x128xf32, #tpu.memory_space<vmem>>, vector<1x1x2x128xf32>
    %185 = vector.shape_cast %184 : vector<1x1x2x128xf32> to vector<2x128xf32>
    %186 = vector.shape_cast %183 : vector<2x128xf32> to vector<1x1x2x128xf32>
    tpu.vector_store %arg7[%c0_88, %c3_89, %c0_90, %c0_91], %186 {strides = array<i32>} : memref<1x4x2x128xf32, #tpu.memory_space<vmem>>, vector<1x1x2x128xf32>,
    return
  }
  func.func @transform_0(%arg0: i32, %arg1: i32) -> i32 {
    %c0_i32 = arith.constant 0 : i32
    %c0_i32_0 = arith.constant 0 : i32
    return %c0_i32 : i32
  }
  func.func @transform_1(%arg0: i32, %arg1: i32) -> i32 {
    %c0_i32 = arith.constant 0 : i32
    %c0_i32_0 = arith.constant 0 : i32
    return %c0_i32 : i32
  }
  func.func @transform_2(%arg0: i32, %arg1: i32) -> (i32, i32, i32, i32) {
    %c0_i32 = arith.constant 0 : i32
    %c0_i32_0 = arith.constant 0 : i32
    %c0_i32_1 = arith.constant 0 : i32
    return %arg0, %c0_i32, %arg1, %c0_i32_0 : i32, i32, i32, i32
  }
  func.func @transform_3(%arg0: i32, %arg1: i32) -> (i32, i32, i32, i32) {
    %c0_i32 = arith.constant 0 : i32
    %c0_i32_0 = arith.constant 0 : i32
    %c0_i32_1 = arith.constant 0 : i32
    return %arg0, %c0_i32, %arg1, %c0_i32_0 : i32, i32, i32, i32
  }
  func.func @transform_4(%arg0: i32, %arg1: i32) -> (i32, i32, i32, i32) {
    %c0_i32 = arith.constant 0 : i32
    %c0_i32_0 = arith.constant 0 : i32
    %c0_i32_1 = arith.constant 0 : i32
    return %arg0, %c0_i32, %arg1, %c0_i32_0 : i32, i32, i32, i32
  }
  func.func @transform_5(%arg0: i32, %arg1: i32) -> (i32, i32, i32, i32) {
    %c0_i32 = arith.constant 0 : i32
    %c0_i32_0 = arith.constant 0 : i32
    %c0_i32_1 = arith.constant 0 : i32
    return %arg0, %c0_i32, %arg1, %c0_i32_0 : i32, i32, i32, i32
  }
}

</mosaic_0001>

<bundles_post_ra>
// kernel: tpu_custom_call.1
= control target key start
LH: loop header
LB: loop body
LE: loop exit
PB: predicated region body
PF: predicated region fallthrough
CT: control target
= control target key end

     0   :  { %s1389_s0 = inlined_call_operand.hbm [shape: f32[32], index: 0, kind: input, shape index: {}]   ;;  %s1390_s1 = inlined_call_operand.vmem [shape: f32[8], index: 1, kind: input, shape index: {}]   ;;  %s1391_s2 = inlined_call_operand.hbm [shape: f32[2,4,2,128], index: 2, kind: input, shape index: {}]   ;;  %s1392_s3 = inlined_call_operand.vmem [shape: f32[2,1,2,128], index: 3, kind: input, shape index: {}]   ;;  %s1393_s4 = inlined_call_operand.hbm [shape: f32[2,4,2,128], index: 4, kind: input, shape index: {}]   ;;  %s1394_s5 = inlined_call_operand.hbm [shape: f32[2,4,2,128], index: 5, kind: output, shape index: {}]  }
   0x1   :  { %1402 = sst [smem:[#allocation19_spill]] %s1389_s0 }
   0x2   :  { %1403 = sst [smem:[#allocation20_spill]] %s1390_s1 }
   0x3   :  { %1404 = sst [smem:[#allocation21_spill]] %s1391_s2 }
   0x4   :  { %1405 = sst [smem:[#allocation22_spill]] %s1392_s3 }
   0x5   :  { %1406 = sst [smem:[#allocation23_spill]] %s1393_s4 }
   0x6   :  { %10 = vsyncpa [#allocation5], 0 }
   0x7   :  { %11 = vsyncpa [#allocation6], 0 }
   0x8   :  { %12 = vsyncpa [#allocation3], 0 }
   0x9   :  { %14 = vsyncpa [#allocation3 + $0x1], 0 }
   0xa   :  { %15 = vsyncpa [#allocation10], 0 }
   0xb   :  { %17 = vsyncpa [#allocation10 + $0x1], 0 }
   0xc   :  { %18 = vsyncpa [#allocation4], 0 }
   0xd   :  { %20 = vsyncpa [#allocation4 + $0x1], 0  ;;  %s1015_s18 = smov 0   ;;  %s1017_s19 = smov 0  }
   0xe   :  { %s1019_s20 = smov 0   ;;  %s1021_s21 = smov 0  }
   0xf   :  { %s1023_s22 = smov 0   ;;  %s1025_s23 = smov 0  }
  0x10 LB: > { %1407 = sst [smem:[#allocation17_spill]] %s970_s22  ;;  %s650_s24 = sadd.s32 4294967295, %s974_s23   ;;  %s974_s23 = sphi %s1025_s23, %s26_s23   ;;  %s970_s22 = sphi %s1023_s22, %s1429_s22   ;;  %s966_s21 = sphi %s1021_s21, %s1428_s21   ;;  %s962_s20 = sphi %s1019_s20, %s1432_s20   ;;  %s958_s19 = sphi %s1017_s19, %s1431_s19   ;;  %s954_s18 = sphi %s1015_s18, %s1430_s18  }
  0x11   : > { %s651_s25 = sadd.s32 4294967294, %s974_s23   ;;  %p96_p0 = scmp.ne.s32.totalorder %s962_s20, %s958_s19 }
  0x12   : > { %p97_p1 = scmp.eq.s32.totalorder %s974_s23, 0  ;;  %p102_p2 = scmp.ne.s32.totalorder %s958_s19, %s954_s18 }
  0x13   : > { %p1053_p3 = scmp.eq.s32.totalorder %s650_s24, 0  ;;  %p184_p4 = scmp.eq.s32.totalorder %s650_s24, 1 }
  0x14   : > { %p98_p5 = por %p97_p1, %p96_p0  ;;  %p190_p6 = scmp.eq.s32.totalorder %s651_s25, 1 }
  0x15   : > { %s1408_s27 = scalar_select %p1053_p3, 1, 0 }
  0x16   : > { %p1059_p7 = por %p1053_p3, %p102_p2  ;;  %p1063_p8 = por %p184_p4, %p96_p0 }
  0x17   : > { %p1067_p9 = por %p190_p6, %p102_p2  ;;  %p652_p10 = scmp.ge.s32.totalorder %s974_s23, 1 }
  0x18   : > { %s1409_s28 = scalar_select %p1059_p7, 1, 0 }
  0x19   : > { %s1410_s29 = scalar_select %p1063_p8, 1, 0 }
  0x1a   : > { %s1411_s30 = scalar_select %p1067_p9, 1, 0 }
  0x1b   : > { %p197_p11 = scmp.lt.s32.totalorder %s974_s23, 3  ;;  %p734_p1 = scmp.lt.s32.totalorder %s974_s23, 2 }
  0x1c   : > { %s1413_s1 = sld [smem:[#allocation20_spill]]  ;;  %s1095_s12 = sand.u32 1, %s962_s20  }
  0x1d   : > { %p1074_p13 = pnand %p652_p10, %p197_p11  ;;  %p1084_p4 = pnand %p734_p1, %p98_p5 }
  0x1e   : > { %s38_s13 = sadd.s32 1, %s970_s22  ;;  %s1416_s0 = sld [smem:[#allocation19_spill]] }
  0x1f   : > { %p714_p0 = pneg %p1074_p13 }
  0x21   : > { %p1090_p2 = pnand %p714_p0, %p1053_p3 }
  0x22   : > { %s219_s9 = sshll.u32 %s1413_s1, 4  ;;  %s220_s9 = int_to_ptr.vmem [resolvable:$true] %s219_s9 }
  0x23   : > { %p794_p6 = pneg %p1090_p2 }
  0x24   : > { %s792_s16 = scalar_lea.hbm %s1416_s0, 16 }
  0x25   : > { %p793_p5 = scmp.ne.s32.totalorder %s1416_s0, %s792_s16  ;;  %p799_p1 = scmp.lt.u32.totalorder %s792_s16, %s1416_s0 }
  0x27   : > { %p795_p10 = pnand %p794_p6, %p793_p5 }
  0x29   : > { %p796_p11 = pneg %p795_p10 }
  0x2b   : > { %p801_p0 = pnand %p799_p1, %p796_p11 }
  0x2d   : > { %804 = shalt.err (!%p801_p0)
}
  0x2e   : > { %s976_s8 = smov [#allocation2]   ;;  %s805_s15 = scalar_lea.vmem %s220_s9, 16 }
  0x2f   : > { %717 = dma.hbm_to_smem (!%p1090_p2), %s1416_s0, 16, %s976_s8, [#allocation5]  }
  0x30   : > { %p806_p12 = scmp.ne.s32.totalorder %s220_s9, %s805_s15  ;;  %p813_p7 = scmp.lt.s32.totalorder %s220_s9, %s220_s9 }
  0x31   : > { %p814_p5 = scmp.lt.s32.totalorder %s805_s15, %s805_s15 }
  0x32   : > { %p808_p9 = pnand %p806_p12, %p794_p6 }
  0x33   : > { %p815_p10 = por %p814_p5, %p813_p7 }
  0x34   : > { %p809_p8 = pneg %p808_p9 }
  0x36   : > { %p816_p3 = pnand %p815_p10, %p809_p8 }
  0x38   : > { %819 = shalt.err (!%p816_p3)
}
  0x39   : > { %s977_s17 = smov [#allocation7]   ;;  %p40_p9 = scmp.ge.s32.totalorder %s38_s13, 2 }
  0x3a   : > { %720 = dma.vmem_to_smem (!%p1090_p2), %s220_s9, 16, %s977_s17, [#allocation6]  }
  0x3b   : > { %s1399_s26 = sshll.u32 %s1095_s12, 3  ;;  %s688_s16 = sshll.u32 %s970_s22, 7 }
  0x3c   : > { %s1434_s13 = smov (%p40_p9, %s38_s13), 0  ;;  %s1418_s2 = sld [smem:[#allocation21_spill]] }
  0x3d   : > { %1417 = sst [smem:[#allocation18_spill]] %s1434_s13  ;;  %s84_s7 = ssub.s32 %s970_s22, %s1434_s13 }
  0x3e   : > { %s234_s9 = scalar_lea.vmem [#allocation8], %s1399_s26  ;;  %p87_p3 = scmp.eq.s32.totalorder %s84_s7, 0 }
  0x3f   : > { %s242_s8 = sshll.u32 %s234_s9, 4  ;;  %s1419_s14 = sadd.s32 1, %s962_s20  ;;  %s1131_s8 = int_to_ptr.vmem [resolvable:$true] %s242_s8 }
  0x40   : > { %s1136_s15 = scalar_select %p87_p3, %s962_s20, %s1419_s14  }
  0x41   : > { %s231_s17 = scalar_lea.sflag [#allocation3], %s1095_s12  ;;  %p822_p8 = pneg %p1084_p4 }
  0x42   : > { %s1125_s11 = scalar_lea.hbm %s1418_s2, %s688_s16  ;;  %s825_s26 = scalar_lea.hbm %s1418_s2, 256 }
  0x43   : > { %s820_s0 = scalar_lea.hbm %s1125_s11, 128  ;;  %p826_p6 = scmp.lt.u32.totalorder %s1125_s11, %s1418_s2 }
  0x44   : > { %p821_p7 = scmp.ne.s32.totalorder %s1125_s11, %s820_s0  ;;  %p827_p11 = scmp.lt.u32.totalorder %s825_s26, %s820_s0 }
  0x45   : > { %p829_p0 = scmp.lt.u32.totalorder %s820_s0, %s1125_s11 }
  0x46   : > { %p823_p12 = pnand %p822_p8, %p821_p7  ;;  %p828_p1 = por %p827_p11, %p826_p6 }
  0x48   : > { %p824_p2 = pneg %p823_p12  ;;  %p830_p5 = por %p829_p0, %p828_p1 }
  0x4a   : > { %p831_p10 = pnand %p830_p5, %p824_p2 }
  0x4c   : > { %834 = shalt.err (!%p831_p10)
}
  0x4d   : > { %s835_s14 = scalar_lea.vmem %s1131_s8, 128  ;;  %s978_s24 = smov [#allocation8]  }
  0x4e   : > { %p836_p9 = scmp.ne.s32.totalorder %s1131_s8, %s835_s14  ;;  %s840_s25 = sshll.u32 %s978_s24, 4  ;;  %s841_s25 = int_to_ptr.vmem [resolvable:$false] %s840_s25 }
  0x4f   : > { %s842_s9 = scalar_lea.vmem %s841_s25, 256  ;;  %p843_p12 = scmp.lt.s32.totalorder %s1131_s8, %s841_s25 }
  0x50   : > { %p838_p3 = pnand %p836_p9, %p822_p8  ;;  %p844_p6 = scmp.lt.s32.totalorder %s842_s9, %s835_s14 }
  0x52   : > { %p839_p7 = pneg %p838_p3  ;;  %p845_p11 = por %p844_p6, %p843_p12 }
  0x54   : > { %p846_p1 = pnand %p845_p11, %p839_p7 }
  0x56   : > { %849 = shalt.err (!%p846_p1)
}
  0x57   : > { %s979_s0 = smov 32   ;;  %s980_s26 = smov 2  }
  0x58   : > { %724 = dma.hbm_to_vmem [thread:$0]  (!%p1084_p4), %s1125_s11, 128, %s1131_s8, %s231_s17, %s979_s0, %s979_s0, %s980_s26  }
  0x59   : > { %s1420_s4 = sld [smem:[#allocation23_spill]]  ;;  %s1421_s25 = sshll.u32 %s1095_s12, 3 }
  0x5a   : > { %s266_s9 = scalar_lea.vmem [#allocation9], %s1421_s25  ;;  %s263_s2 = scalar_lea.sflag [#allocation10], %s1095_s12 }
  0x5b   : > { %s274_s1 = sshll.u32 %s266_s9, 4  ;;  %s1178_s1 = int_to_ptr.vmem [resolvable:$true] %s274_s1 }
  0x5f   : > { %s1174_s24 = scalar_lea.hbm %s1420_s4, %s688_s16  ;;  %s855_s16 = scalar_lea.hbm %s1420_s4, 256 }
  0x60   : > { %s850_s13 = scalar_lea.hbm %s1174_s24, 128  ;;  %p856_p10 = scmp.lt.u32.totalorder %s1174_s24, %s1420_s4 }
  0x61   : > { %p851_p2 = scmp.ne.s32.totalorder %s1174_s24, %s850_s13  ;;  %p857_p9 = scmp.lt.u32.totalorder %s855_s16, %s850_s13 }
  0x62   : > { %p859_p7 = scmp.lt.u32.totalorder %s850_s13, %s1174_s24 }
  0x63   : > { %p853_p0 = pnand %p851_p2, %p822_p8  ;;  %p858_p3 = por %p857_p9, %p856_p10 }
  0x65   : > { %p854_p5 = pneg %p853_p0  ;;  %p860_p12 = por %p859_p7, %p858_p3 }
  0x67   : > { %p861_p6 = pnand %p860_p12, %p854_p5 }
  0x69   : > { %864 = shalt.err (!%p861_p6)
}
  0x6a   : > { %s865_s14 = scalar_lea.vmem %s1178_s1, 128  ;;  %s981_s25 = smov [#allocation9]  }
  0x6b   : > { %p866_p11 = scmp.ne.s32.totalorder %s1178_s1, %s865_s14  ;;  %s870_s9 = sshll.u32 %s981_s25, 4  ;;  %s871_s9 = int_to_ptr.vmem [resolvable:$false] %s870_s9 }
  0x6c   : > { %s872_s11 = scalar_lea.vmem %s871_s9, 256  ;;  %p873_p0 = scmp.lt.s32.totalorder %s1178_s1, %s871_s9 }
  0x6d   : > { %p868_p1 = pnand %p866_p11, %p822_p8  ;;  %p874_p10 = scmp.lt.s32.totalorder %s872_s11, %s865_s14 }
  0x6f   : > { %p869_p2 = pneg %p868_p1  ;;  %p875_p9 = por %p874_p10, %p873_p0 }
  0x71   : > { %p876_p3 = pnand %p875_p9, %p869_p2 }
  0x73   : > { %879 = shalt.err (!%p876_p3)
}
  0x74   : > { %727 = dma.hbm_to_vmem [thread:$0]  (!%p1084_p4), %s1174_s24, 128, %s1178_s1, %s263_s2, %s979_s0, %s979_s0, %s980_s26  }
  0x75   : > { %286 = sbr.rel (%p1074_p13) target bundleno = 195 (0xc3), region = 40  ;;  %p1422_p8 = scmp.ne.s32.totalorder (!%p1074_p13), %s1408_s27, 0 }
  0x7c   : > { %933 = dma.done.wait (%p1422_p8), [#allocation5], 16  }
  0x7d   : > { %935 = vsyncadd (%p1422_p8), [#allocation5], 4294967280 }
  0x7e   : > { %937 = dma.done.wait (%p1422_p8), [#allocation6], 16  }
  0x7f   : > { %939 = vsyncadd (%p1422_p8), [#allocation6], 4294967280  ;;  %s1220_s10 = sand.u32 1, %s958_s19   ;;  %p1423_p13 = scmp.ne.s32.totalorder %s1409_s28, 0 }
  0x80   : > { %s1223_s1 = sshll.u32 %s1220_s10, 3  ;;  %s297_s2 = scalar_lea.sflag [#allocation3], %s1220_s10 }
  0x81   : > { %s1227_s6 = scalar_lea.vmem [#allocation8], %s1223_s1 }
  0x82   : > { %941 = dma.done.wait (%p1423_p13), %s297_s2, 128  }
  0x83   : > { %943 = vsyncadd (%p1423_p13), %s297_s2, 4294967168  ;;  %s306_s27 = scalar_lea.sflag [#allocation10], %s1220_s10  ;;  %s1235_s12 = scalar_lea.vmem [#allocation9], %s1223_s1 }
  0x84   : > { %945 = dma.done.wait (%p1423_p13), %s306_s27, 128  }
  0x85   : > { %947 = vsyncadd (%p1423_p13), %s306_s27, 4294967168 }
  0x86   : > { %314 = sfence }
  0x87   : > { %p349_p4 = scmp.lt.s32.totalorder %s966_s21, 1  ;;  %s1243_s13 = sshll.u32 %s966_s21, 4  ;;  %v1254_v0 = vld [vmem:[%s1227_s6] sm:$0x3]  ;;  %v1262_v1 = vld [vmem:[%s1227_s6 + $0x2] sm:$0x3] }
  0x88   : > { %s366_s26 = sld [smem:[#allocation2 + %s1243_s13]]  ;;  %s369_s28 = sadd.s32 1, %s1243_s13  ;;  %v1270_v3 = vld [vmem:[%s1227_s6 + $0x4] sm:$0x3]  ;;  %v1274_v6 = vld [vmem:[%s1227_s6 + $0x6] sm:$0x3] }
  0x89   : > { %s350_s0 = scalar_select %p349_p4, %s966_s21, 1  ;;  %v388_v24 = vld [vmem:[%s1235_s12] sm:$0x3]  ;;  %v675_v46 = vld [vmem:[%s1235_s12 + $0x2] sm:$0x3] }
  0x8a   : > { %s1249_s24 = sshll.u32 %s966_s21, 2  ;;  %s370_s8 = sld [smem:[#allocation2 + %s369_s28]]  ;;  %v678_v62 = vld [vmem:[%s1235_s12 + $0x4] sm:$0x3] }
  0x8b   : > { %s668_s16 = sshll.u32 %s350_s0, 1  ;;  %s374_s17 = sadd.s32 2, %s1243_s13 }
  0x8c   : > { %s375_s7 = sld [smem:[#allocation2 + %s374_s17]]  ;;  %s379_s14 = sadd.s32 3, %s1243_s13 }
  0x8d   : > { %s380_s25 = sld [smem:[#allocation2 + %s379_s14]]  ;;  %s393_s4 = sadd.s32 1, %s1249_s24 }
  0x8e   : > { %s1424_s3 = sld [smem:[#allocation22_spill]]  ;;  %v367_v2 = vstv %s366_s26  ;;  %s691_s28 = sadd.s32 4, %s1243_s13 }
  0x8f   : > { %s1265_s27 = sld [smem:[#allocation7 + %s1249_s24]]  ;;  %v368_v4 = vmul.f32 %v367_v2, %v1254_v0  ;;  %s398_s17 = sadd.s32 1, %s691_s28 }
  0x90   : > { %v371_v5 = vstv %s370_s8  ;;  %s395_s0 = sld [smem:[#allocation2 + %s691_s28]]  ;;  %s403_s14 = sadd.s32 2, %s691_s28 }
  0x91   : > { %v372_v7 = vmul.f32 %v1262_v1, %v371_v5  ;;  %s404_s26 = sld [smem:[#allocation2 + %s403_s14]]  ;;  %s408_s9 = sadd.s32 3, %s691_s28 }
  0x92   : > { %v376_v8 = vstv %s375_s7  ;;  %s409_s11 = sld [smem:[#allocation2 + %s408_s9]]  ;;  %s693_s6 = sadd.s32 8, %s1243_s13 }
  0x93   : > { %v373_v9 = vadd.f32 %v372_v7, %v368_v4  ;;  %v377_v10 = vmul.f32 %v1270_v3, %v376_v8  ;;  %v381_v11 = vstv %s380_s25  ;;  %s1278_s8 = sld [smem:[#allocation7 + %s393_s4]]  ;;  %s434_s28 = sadd.s32 2, %s693_s6 }
  0x94   : > { %s1259_s2 = scalar_lea.vmem %s1424_s3, %s668_s16  ;;  %s399_s16 = sld [smem:[#allocation2 + %s398_s17]]  ;;  %v382_v12 = vmul.f32 %v1274_v6, %v381_v11 }
  0x95   : > { %s424_s3 = sadd.s32 2, %s1249_s24  ;;  %v378_v13 = vadd.f32 %v377_v10, %v373_v9  ;;  %s1283_s22 = sld [smem:[#allocation2 + %s693_s6]]  ;;  %v385_v14 = vstv %s1265_s27  ;;  %v364_v29 = vld [vmem:[%s1259_s2] sm:$0x3]  ;;  %v681_v9 = vld [vmem:[%s1235_s12 + $0x6] sm:$0x3] }
  0x96   : > { %s429_s17 = sadd.s32 1, %s693_s6  ;;  %v396_v15 = vstv %s395_s0  ;;  %s1289_s4 = sld [smem:[#allocation2 + %s434_s28]] }
  0x97   : > { %s1286_s7 = sld [smem:[#allocation2 + %s429_s17]]  ;;  %v383_v16 = vadd.f32 %v382_v12, %v378_v13  ;;  %v397_v17 = vmul.f32 %v396_v15, %v1254_v0  ;;  %s439_s25 = sadd.s32 3, %s693_s6  ;;  %v405_v20 = vstv %s404_s26 }
  0x98   : > { %s1292_s14 = sld [smem:[#allocation2 + %s439_s25]]  ;;  %v406_v22 = vmul.f32 %v1270_v3, %v405_v20  ;;  %v410_v23 = vstv %s409_s11  ;;  %s455_s0 = sadd.s32 3, %s1249_s24 }
  0x99   : > { %s1294_s27 = sld [smem:[#allocation7 + %s424_s3]]  ;;  %v386_v21 = vadd.f32 %v385_v14, %v383_v16  ;;  %s695_s9 = sadd.s32 12, %s1243_s13  ;;  %v411_v26 = vmul.f32 %v1274_v6, %v410_v23  ;;  %v414_v34 = vstv %s1278_s8 }
  0x9a   : > { %v400_v18 = vstv %s399_s16  ;;  %s457_s16 = sld [smem:[#allocation2 + %s695_s9]]  ;;  %s460_s26 = sadd.s32 1, %s695_s9 }
  0x9b   : > { %v401_v19 = vmul.f32 %v1262_v1, %v400_v18  ;;  %v387_v27 = vadd.f32 %v386_v21, %v1254_v0  ;;  %v427_v28 = vstv %s1283_s22  ;;  %s461_s3 = sld [smem:[#allocation2 + %s460_s26]]  ;;  %s465_s6 = sadd.s32 2, %s695_s9 }
  0x9c   : > { %v428_v31 = vmul.f32 %v427_v28, %v1254_v0  ;;  %s466_s13 = sld [smem:[#allocation2 + %s465_s6]]  ;;  %s470_s24 = sadd.s32 3, %s695_s9  ;;  %v436_v36 = vstv %s1289_s4 }
  0x9d   : > { %v402_v25 = vadd.f32 %v401_v19, %v397_v17  ;;  %v431_v32 = vstv %s1286_s7  ;;  %v389_v33 = vsub.f32 %v388_v24, %v387_v27  ;;  %s471_s11 = sld [smem:[#allocation2 + %s470_s24]]  ;;  %v437_v38 = vmul.f32 %v1270_v3, %v436_v36  ;;  %s1320_s2 = scalar_lea.vmem [#allocation11], %s1223_s1 }
  0x9e   : > { %v432_v35 = vmul.f32 %v1262_v1, %v431_v32  ;;  %v441_v39 = vstv %s1292_s14  ;;  %s1312_s22 = sld [smem:[#allocation7 + %s455_s0]]  ;;  %s501_s1 = sshll.u32 %s1320_s2, 4  ;;  %s1334_s1 = int_to_ptr.vmem [resolvable:$true] %s501_s1 }
  0x9f   : > { %v407_v30 = vadd.f32 %v406_v22, %v402_v25  ;;  %v390_v40 = vmul.f32 %v389_v33, %v364_v29  ;;  %v442_v42 = vmul.f32 %v1274_v6, %v441_v39  ;;  %v445_v51 = vstv %s1294_s27  ;;  %s696_s8 = sshll.u32 %s966_s21, 7  ;;  %s487_s12 = scalar_lea.sflag [#allocation4], %s1220_s10 }
  0xa0   : > { %v433_v41 = vadd.f32 %v432_v35, %v428_v31  ;;  %v458_v44 = vstv %s457_s16  ;;  %s1339_s28 = scalar_lea.hbm %s1394_s5, %s696_s8  ;;  %s880_s4 = scalar_lea.vmem %s1334_s1, 128 }
  0xa1   : > { %v412_v37 = vadd.f32 %v411_v26, %v407_v30  ;;  %v391_v45 = vadd.f32 %v390_v40, %v387_v27  ;;  %v459_v48 = vmul.f32 %v458_v44, %v1254_v0  ;;  %v462_v49 = vstv %s461_s3  ;;  %p881_p5 = scmp.ne.s32.totalorder %s1334_s1, %s880_s4  ;;  %p1425_p7 = scmp.ne.s32.totalorder %s1410_s29, 0 }
  0xa2   : > { %v438_v47 = vadd.f32 %v437_v38, %v433_v41  ;;  %v463_v52 = vmul.f32 %v1262_v1, %v462_v49  ;;  %v467_v53 = vstv %s466_s13  ;;  %s982_s21 = smov [#allocation11]  }
  0xa3   : > { %v415_v43 = vadd.f32 %v414_v34, %v412_v37  ;;  %392 = vst [vmem:[%s1320_s2] sm:$0x3] %v391_v45  ;;  %v468_v55 = vmul.f32 %v1270_v3, %v467_v53  ;;  %v472_v56 = vstv %s471_s11  ;;  %p882_p12 = pnand %p881_p5, %p1425_p7  ;;  %s884_s25 = sshll.u32 %s982_s21, 4  ;;  %s885_s25 = int_to_ptr.vmem [resolvable:$false] %s884_s25 }
  0xa4   : > { %v443_v54 = vadd.f32 %v442_v42, %v438_v47  ;;  %v464_v58 = vadd.f32 %v463_v52, %v459_v48  ;;  %v473_v59 = vmul.f32 %v1274_v6, %v472_v56  ;;  %s886_s14 = scalar_lea.vmem %s885_s25, 256  ;;  %p887_p11 = scmp.lt.s32.totalorder %s1334_s1, %s885_s25 }
  0xa5   : > { %v416_v50 = vadd.f32 %v1262_v1, %v415_v43  ;;  %v476_v1 = vstv %s1312_s22  ;;  %p883_p6 = pneg %p882_p12  ;;  %p888_p1 = scmp.lt.s32.totalorder %s886_s14, %s880_s4 }
  0xa6   : > { %v446_v60 = vadd.f32 %v445_v51, %v443_v54  ;;  %v469_v63 = vadd.f32 %v468_v55, %v464_v58 }
  0xa7   : > { %v419_v57 = vsub.f32 %v675_v46, %v416_v50  ;;  %p889_p2 = por %p888_p1, %p887_p11 }
  0xa8   : > { %v447_v0 = vadd.f32 %v1270_v3, %v446_v60  ;;  %v474_v4 = vadd.f32 %v473_v59, %v469_v63 }
  0xa9   : > { %v420_v61 = vmul.f32 %v419_v57, %v364_v29  ;;  %p890_p0 = pnand %p889_p2, %p883_p6 }
  0xaa   : > { %v450_v5 = vsub.f32 %v678_v62, %v447_v0  ;;  %v477_v7 = vadd.f32 %v476_v1, %v474_v4 }
  0xab   : > { %v421_v2 = vadd.f32 %v420_v61, %v416_v50 }
  0xac   : > { %v451_v8 = vmul.f32 %v450_v5, %v364_v29  ;;  %v478_v10 = vadd.f32 %v1274_v6, %v477_v7 }
  0xad   : > { %676 = vst [vmem:[%s1320_s2 + $0x2] sm:$0x3] %v421_v2 }
  0xae   : > { %v452_v11 = vadd.f32 %v451_v8, %v447_v0  ;;  %v481_v12 = vsub.f32 %v681_v9, %v478_v10 }
  0xb0   : > { %679 = vst [vmem:[%s1320_s2 + $0x4] sm:$0x3] %v452_v11  ;;  %v482_v3 = vmul.f32 %v481_v12, %v364_v29 }
  0xb2   : > { %v483_v13 = vadd.f32 %v482_v3, %v478_v10 }
  0xb4   : > { %682 = vst [vmem:[%s1320_s2 + $0x6] sm:$0x3] %v483_v13 }
  0xb5   : > { %893 = shalt.err (!%p890_p0)
}
  0xb6   : > { %s894_s27 = scalar_lea.hbm %s1339_s28, 128  ;;  %s898_s16 = scalar_lea.hbm %s1394_s5, 256 }
  0xb7   : > { %p895_p10 = scmp.ne.s32.totalorder %s1339_s28, %s894_s27  ;;  %p899_p8 = scmp.lt.u32.totalorder %s1339_s28, %s1394_s5 }
  0xb8   : > { %p900_p13 = scmp.lt.u32.totalorder %s898_s16, %s894_s27  ;;  %p902_p5 = scmp.lt.u32.totalorder %s894_s27, %s1339_s28 }
  0xb9   : > { %p896_p9 = pnand %p895_p10, %p1425_p7 }
  0xba   : > { %p901_p4 = por %p900_p13, %p899_p8 }
  0xbb   : > { %p897_p3 = pneg %p896_p9 }
  0xbc   : > { %p903_p12 = por %p902_p5, %p901_p4 }
  0xbe   : > { %p904_p6 = pnand %p903_p12, %p897_p3 }
  0xc0   : > { %907 = shalt.err (!%p904_p6)
}
  0xc1   : > { %s983_s6 = smov 32   ;;  %s984_s13 = smov 2  }
  0xc2   : > { %712 = dma.vmem_to_hbm [thread:$0]  (%p1425_p7), %s1334_s1, 128, %s1339_s28, %s487_s12, %s983_s6, %s983_s6, %s984_s13  }
  0xc3 PF: > { %s516_s24 = sand.u32 1, %s954_s18   ;;  %p1426_p11 = scmp.ne.s32.totalorder %s1411_s30, 0 }
  0xc4   : > { %p1427_p1 = scmp.ge.s32.totalorder %s974_s23, 2  ;;  %s517_s11 = scalar_lea.sflag [#allocation4], %s516_s24 }
  0xc6   : > { %p729_p2 = pnand %p1427_p1, %p1426_p11 }
  0xc8   : > { %949 = dma.done.wait (!%p729_p2), %s517_s11, 128  }
  0xc9   : > { %951 = vsyncadd (!%p729_p2), %s517_s11, 4294967168  ;;  %s26_s23 = sadd.s32 1, %s974_s23   ;;  %s1428_s21 = sld [smem:[#allocation17_spill]] }
  0xca   : > { %p23_p0 = scmp.ge.s32.totalorder %s26_s23, 4   ;;  %s1429_s22 = sld [smem:[#allocation18_spill]] }
  0xcb   : > { %s1430_s18 = smov %s958_s19  ;;  %s1431_s19 = smov %s962_s20 }
  0xcc   : > { %s1432_s20 = smov %s1136_s15  ;;  %25 = sbr.rel (!%p23_p0) target bundleno = 16 (0x10), region = 120 }
  0xd3   :  { %522 = vsyncpa [#allocation3], 1 }
  0xd4   :  { %524 = vsyncpa [#allocation3 + $0x1], 1 }
  0xd5   :  { %525 = vsyncpa [#allocation10], 1 }
  0xd6   :  { %527 = vsyncpa [#allocation10 + $0x1], 1 }
  0xd7   :  { %528 = vsyncpa [#allocation4], 1 }
  0xd8   :  { %530 = vsyncpa [#allocation4 + $0x1], 1 }
  0xd9   :  { %531 = vsyncpa [#allocation5], 1 }
  0xda   :  { %533 = vsyncpa [#allocation5 + $0x1], 1 }
  0xdb   :  { %534 = vsyncpa [#allocation6], 1 }
  0xdc   :  { %536 = vsyncpa [#allocation6 + $0x1], 1 }

</bundles_post_ra>
